<compile_context>
chip_gen: v7x
topology: tpu7x:2x2x1
jax: 0.10.0
libtpu: 0.0.40
codegen_flags: <defaults>
</compile_context>

<pallas_src>
import functools

import jax
import jax.numpy as jnp
import numpy as np
from jax.experimental import pallas as pl
from jax.experimental.pallas import tpu as pltpu

LANE = 128


def _round_up(x, m):
    return (x + m - 1) // m * m


def _fusion_kernel(n_channels, x_ref, w_ref, o_ref):
    """x_ref: [TB, Dk]          concatenated embeddings + ones column, K padded to 128
       w_ref: [Dk, (C+1)*128]   fused (projections | logits) weight, biases folded in
       o_ref: [TB, 128]         fused output, lanes >= P are zero (sliced off by wrapper)
    """
    C = n_channels

    # Single MXU push: logits and all per-channel projections at once (bias included
    # via the ones column of x).
    y = jnp.dot(x_ref[...], w_ref[...], preferred_element_type=jnp.float32)

    # Attention softmax over the C logit lanes.
    logits = y[:, C * LANE:C * LANE + C]                       # [TB, C]
    m = jnp.max(logits, axis=-1, keepdims=True)
    e = jnp.exp(logits - m)
    attn = e * pl.reciprocal(jnp.sum(e, axis=-1, keepdims=True), approx=True)

    # Weighted sum of the C lane-aligned projection blocks; init from channel 0.
    acc = attn[:, 0:1] * y[:, 0:LANE]
    for c in range(1, C):
        acc = acc + attn[:, c:c + 1] * y[:, c * LANE:(c + 1) * LANE]

    o_ref[...] = acc.astype(o_ref.dtype)                       # lane-dense [TB, 128] store


def attention_fusion(embeddings, params, encoding_projection_dim, *,
                     batch_tile=128, operand_dtype=jnp.float32):
    """embeddings: dict channel -> [B, D_c] float32.
    params: 'attn_w' [Dtot, C], 'attn_b' [1, C],
            'proj_w'[ch] [D_c, P], 'proj_b'[ch] [1, P]   (all pre-transposed).
    """
    channels = sorted(embeddings.keys())
    dims = [embeddings[c].shape[-1] for c in channels]
    C = len(channels)
    P = encoding_projection_dim
    assert P <= LANE, "projection dim must fit one lane tile"
    B = embeddings[channels[0]].shape[0]

    d_tot = sum(dims)
    d_k = _round_up(d_tot + 1, LANE)          # +1 row carries the biases
    n_p = (C + 1) * LANE                      # C projection blocks + 1 logits block
    TB = batch_tile
    b_pad = _round_up(max(B, 1), TB)

    # ---- host-side packing (once per call) ----
    x_cat = jnp.concatenate([embeddings[c] for c in channels], axis=-1)  # [B, Dtot]
    x_pad = jnp.zeros((b_pad, d_k), jnp.float32)
    x_pad = x_pad.at[:B, :d_tot].set(x_cat)
    x_pad = x_pad.at[:B, d_tot].set(1.0)      # bias column

    w_all = jnp.zeros((d_k, n_p), jnp.float32)
    off = 0
    for ci, ch in enumerate(channels):
        d = dims[ci]
        w_all = w_all.at[off:off + d, ci * LANE:ci * LANE + P].set(params["proj_w"][ch])
        w_all = w_all.at[d_tot, ci * LANE:ci * LANE + P].set(params["proj_b"][ch][0])
        off += d
    w_all = w_all.at[:d_tot, C * LANE:C * LANE + C].set(params["attn_w"])
    w_all = w_all.at[d_tot, C * LANE:C * LANE + C].set(params["attn_b"][0])

    x_pad = x_pad.astype(operand_dtype)
    w_all = w_all.astype(operand_dtype)

    kernel = functools.partial(_fusion_kernel, C)
    out_pad = pl.pallas_call(
        kernel,
        out_shape=jax.ShapeDtypeStruct((b_pad, LANE), jnp.float32),
        grid_spec=pltpu.PrefetchScalarGridSpec(
            num_scalar_prefetch=0,
            grid=(b_pad // TB,),
            in_specs=[
                pl.BlockSpec((TB, d_k), lambda i: (i, 0)),    # batch-tiled activations
                pl.BlockSpec((d_k, n_p), lambda i: (0, 0)),   # VMEM-resident fused weight
            ],
            out_specs=pl.BlockSpec((TB, LANE), lambda i: (i, 0)),
        ),
        compiler_params=pltpu.CompilerParams(
            dimension_semantics=("parallel",)),
    )(x_pad, w_all)

    return out_pad[:B, :P]


def _reference(embeddings, params):
    """Plain-JAX reference mirroring the PyTorch forward."""
    channels = sorted(embeddings.keys())
    x_cat = jnp.concatenate([embeddings[c] for c in channels], axis=-1)
    attn = jax.nn.softmax(x_cat @ params["attn_w"] + params["attn_b"], axis=-1)
    projected = [embeddings[c] @ params["proj_w"][c] + params["proj_b"][c]
                 for c in channels]
    weighted = [attn[:, i:i + 1] * projected[i] for i in range(len(channels))]
    return jnp.sum(jnp.stack(weighted), axis=0)


if __name__ == "__main__":
    channel_to_encoder_dim = {"audio": 16, "rgb": 32, "text": 48}
    channels = sorted(channel_to_encoder_dim.keys())
    attn_in_dim = sum(channel_to_encoder_dim.values())   # 96
    n_ch = len(channel_to_encoder_dim)                   # 3
    proj_dim = min(channel_to_encoder_dim.values())      # 16 (default encoding_projection_dim)
    B = 8

    key = jax.random.PRNGKey(0)
    keys = jax.random.split(key, 3 + 2 * n_ch)

    # Deterministic synthetic parameters (uniform init, not a checkpoint load).
    params = {
        "attn_w": jax.random.uniform(keys[0], (attn_in_dim, n_ch), jnp.float32, -0.1, 0.1),
        "attn_b": jax.random.uniform(keys[1], (1, n_ch), jnp.float32, -0.1, 0.1),
        "proj_w": {},
        "proj_b": {},
    }
    for i, c in enumerate(channels):
        d = channel_to_encoder_dim[c]
        params["proj_w"][c] = jax.random.uniform(
            keys[2 + 2 * i], (d, proj_dim), jnp.float32, -0.1, 0.1)
        params["proj_b"][c] = jax.random.uniform(
            keys[3 + 2 * i], (1, proj_dim), jnp.float32, -0.1, 0.1)

    ekey = jax.random.split(keys[-1], n_ch)
    embeddings = {
        c: jax.random.normal(ekey[i], (B, channel_to_encoder_dim[c]), jnp.float32)
        for i, c in enumerate(channels)
    }

    out = attention_fusion(embeddings, params, proj_dim)
    out = jax.block_until_ready(out)

    ref = _reference(embeddings, params)
    # approx=True reciprocal in the softmax denominator -> allow ~1e-3-level deviation.
    np.testing.assert_allclose(np.asarray(out), np.asarray(ref), rtol=2e-3, atol=2e-3)

    print("KERNEL_OK")
</pallas_src>

<mosaic_0001>
module attributes {stable_mosaic.version = 11 : i64} {
  func.func @_fusion_kernel(%arg0: i32, %arg1: memref<128x128xf32, #tpu.memory_space<vmem>>, %arg2: memref<128x512xf32, #tpu.memory_space<vmem>>, %arg3: memref<128x128xf32, #tpu.memory_space<vmem>>) attributes {dimension_semantics = [#tpu.dimension_semantics<parallel>], iteration_bounds = array<i64: 1>, scalar_prefetch = 0 : i64, scratch_operands = 0 : i64, tpu.core_type = #tpu.core_type<tc>, window_params = [{transform_indices = @transform_0, window_bounds = array<i64: 128, 128>}, {pipeline_mode = #tpu.pipeline_mode<synchronous>, transform_indices = @transform_1, window_bounds = array<i64: 128, 512>}, {transform_indices = @transform_2, window_bounds = array<i64: 128, 128>}]} {
    %c0 = arith.constant 0 : index
    %c0_0 = arith.constant 0 : index
    %0 = vector.load %arg1[%c0, %c0_0] : memref<128x128xf32, #tpu.memory_space<vmem>>, vector<128x128xf32>
    %c0_1 = arith.constant 0 : index
    %c0_2 = arith.constant 0 : index
    %1 = vector.load %arg2[%c0_1, %c0_2] : memref<128x512xf32, #tpu.memory_space<vmem>>, vector<128x512xf32>
    %cst = arith.constant dense<0.000000e+00> : vector<128x512xf32>
    %2 = tpu.matmul %0, %1, %cst {dimension_numbers = #tpu.dot_dimension_numbers<[1], [0], [0], [1], [0, 0, 1, 1], [], []>} : vector<128x128xf32>, vector<128x512xf32>, vector<128x512xf32> -> vector<128x512xf32>
    %3 = vector.extract_strided_slice %2 {offsets = [0, 384], sizes = [128, 3], strides = [1, 1]} : vector<128x512xf32> to vector<128x3xf32>
    %cst_3 = arith.constant dense<0xFF800000> : vector<128xf32>
    %4 = vector.multi_reduction <maximumf>, %3, %cst_3 [1] : vector<128x3xf32> to vector<128xf32>
    %5 = vector.shape_cast %4 : vector<128xf32> to vector<128x1xf32>
    %6 = vector.broadcast %5 : vector<128x1xf32> to vector<128x3xf32>
    %7 = arith.subf %3, %6 : vector<128x3xf32>
    %8 = math.exp %7 : vector<128x3xf32>
    %cst_4 = arith.constant dense<0.000000e+00> : vector<128xf32>
    %9 = vector.multi_reduction <add>, %8, %cst_4 [1] : vector<128x3xf32> to vector<128xf32>
    %10 = vector.shape_cast %9 : vector<128xf32> to vector<128x1xf32>
    %11 = tpu.reciprocal %10 {approx = true} : vector<128x1xf32> -> vector<128x1xf32>
    %12 = vector.broadcast %11 : vector<128x1xf32> to vector<128x3xf32>
    %13 = arith.mulf %8, %12 : vector<128x3xf32>
    %14 = vector.extract_strided_slice %13 {offsets = [0, 0], sizes = [128, 1], strides = [1, 1]} : vector<128x3xf32> to vector<128x1xf32>
    %15 = vector.extract_strided_slice %2 {offsets = [0, 0], sizes = [128, 128], strides = [1, 1]} : vector<128x512xf32> to vector<128x128xf32>
    %16 = vector.broadcast %14 : vector<128x1xf32> to vector<128x128xf32>
    %17 = arith.mulf %16, %15 : vector<128x128xf32>
    %18 = vector.extract_strided_slice %13 {offsets = [0, 1], sizes = [128, 1], strides = [1, 1]} : vector<128x3xf32> to vector<128x1xf32>
    %19 = vector.extract_strided_slice %2 {offsets = [0, 128], sizes = [128, 128], strides = [1, 1]} : vector<128x512xf32> to vector<128x128xf32>
    %20 = vector.broadcast %18 : vector<128x1xf32> to vector<128x128xf32>
    %21 = arith.mulf %20, %19 : vector<128x128xf32>
    %22 = arith.addf %17, %21 : vector<128x128xf32>
    %23 = vector.extract_strided_slice %13 {offsets = [0, 2], sizes = [128, 1], strides = [1, 1]} : vector<128x3xf32> to vector<128x1xf32>
    %24 = vector.extract_strided_slice %2 {offsets = [0, 256], sizes = [128, 128], strides = [1, 1]} : vector<128x512xf32> to vector<128x128xf32>
    %25 = vector.broadcast %23 : vector<128x1xf32> to vector<128x128xf32>
    %26 = arith.mulf %25, %24 : vector<128x128xf32>
    %27 = arith.addf %22, %26 : vector<128x128xf32>
    %c0_5 = arith.constant 0 : index
    %c0_6 = arith.constant 0 : index
    %28 = vector.load %arg3[%c0_5, %c0_6] : memref<128x128xf32, #tpu.memory_space<vmem>>, vector<128x128xf32>
    tpu.vector_store %arg3[%c0_5, %c0_6], %27 {strides = array<i32>} : memref<128x128xf32, #tpu.memory_space<vmem>>, vector<128x128xf32>,
    return
  }
  func.func @transform_0(%arg0: i32) -> (i32, i32) {
    %c0_i32 = arith.constant 0 : i32
    %c0_i32_0 = arith.constant 0 : i32
    return %arg0, %c0_i32 : i32, i32
  }
  func.func @transform_1(%arg0: i32) -> (i32, i32) {
    %c0_i32 = arith.constant 0 : i32
    %c0_i32_0 = arith.constant 0 : i32
    %c0_i32_1 = arith.constant 0 : i32
    return %c0_i32, %c0_i32_0 : i32, i32
  }
  func.func @transform_2(%arg0: i32) -> (i32, i32) {
    %c0_i32 = arith.constant 0 : i32
    %c0_i32_0 = arith.constant 0 : i32
    return %arg0, %c0_i32 : i32, i32
  }
}

</mosaic_0001>

<bundles_post_ra>
// kernel: tpu_custom_call.1
= control target key start
LH: loop header
LB: loop body
LE: loop exit
PB: predicated region body
PF: predicated region fallthrough
CT: control target
= control target key end

     0   :  { %7 = vsyncpa [#allocation3], 0  ;;  %s1736_s0 = inlined_call_operand.hbm [shape: f32[128,128], index: 0, kind: input, shape index: {}]   ;;  %s1737_s1 = inlined_call_operand.hbm [shape: f32[128,512], index: 1, kind: input, shape index: {}]   ;;  %s1738_s2 = inlined_call_operand.hbm [shape: f32[128,128], index: 2, kind: output, shape index: {}]  }
   0x1   :  { %8 = vsyncpa [#allocation6], 0 }
   0x2   :  { %9 = vsyncpa [#allocation4], 0  ;;  %s1200_s9 = smov [#allocation2]   ;;  %s1128_s13 = scalar_lea.hbm %s1736_s0, 2048 }
   0x3   :  { %s15_s10 = sshll.u32 %s1200_s9, 4  ;;  %p1129_p0 = scmp.ne.s32.totalorder %s1736_s0, %s1128_s13  ;;  %s16_s10 = int_to_ptr.vmem [resolvable:$true] %s15_s10 }
   0x4   :  { %p1132_p1 = scmp.lt.u32.totalorder %s1128_s13, %s1736_s0 }
   0x6   :  { %p1134_p2 = pnand %p1132_p1, %p1129_p0 }
   0x8   :  { %1137 = shalt.err (!%p1134_p2)
}
   0x9   :  { %s1138_s18 = scalar_lea.vmem %s16_s10, 2048  ;;  %p1143_p4 = scmp.lt.s32.totalorder %s16_s10, %s16_s10 }
   0xa   :  { %p1139_p3 = scmp.ne.s32.totalorder %s16_s10, %s1138_s18  ;;  %p1144_p5 = scmp.lt.s32.totalorder %s1138_s18, %s1138_s18 }
   0xc   :  { %p1145_p6 = por %p1144_p5, %p1143_p4 }
   0xe   :  { %p1146_p7 = pnand %p1145_p6, %p1139_p3 }
  0x10   :  { %1149 = shalt.err (!%p1146_p7)
}
  0x11   :  { %s1201_s19 = smov 128   ;;  %s1202_s20 = smov 8  }
  0x12   :  { %21 = dma.hbm_to_vmem [thread:$0]  %s1736_s0, 2048, %s16_s10, [#allocation3], %s1201_s19, %s1201_s19, %s1202_s20  }
  0x13   :  { %s1203_s23 = smov [#allocation5]   ;;  %s1150_s27 = scalar_lea.hbm %s1737_s1, 8192 }
  0x14   :  { %s27_s24 = sshll.u32 %s1203_s23, 4  ;;  %p1151_p8 = scmp.ne.s32.totalorder %s1737_s1, %s1150_s27  ;;  %s28_s24 = int_to_ptr.vmem [resolvable:$true] %s27_s24 }
  0x15   :  { %p1154_p9 = scmp.lt.u32.totalorder %s1150_s27, %s1737_s1 }
  0x17   :  { %p1156_p10 = pnand %p1154_p9, %p1151_p8 }
  0x19   :  { %1159 = shalt.err (!%p1156_p10)
}
  0x1a   :  { %s1160_s4 = scalar_lea.vmem %s28_s24, 8192  ;;  %p1165_p12 = scmp.lt.s32.totalorder %s28_s24, %s28_s24 }
  0x1b   :  { %p1161_p11 = scmp.ne.s32.totalorder %s28_s24, %s1160_s4  ;;  %p1166_p13 = scmp.lt.s32.totalorder %s1160_s4, %s1160_s4 }
  0x1d   :  { %p1167_p0 = por %p1166_p13, %p1165_p12 }
  0x1f   :  { %p1168_p1 = pnand %p1167_p0, %p1161_p11 }
  0x21   :  { %1171 = shalt.err (!%p1168_p1)
}
  0x22   :  { %s1204_s0 = smov 512   ;;  %s1205_s5 = smov 32  }
  0x23   :  { %33 = dma.hbm_to_vmem [thread:$0]  %s1737_s1, 8192, %s28_s24, [#allocation6], %s1204_s0, %s1204_s0, %s1205_s5  }
  0x24   :  { %1194 = dma.done.wait [#allocation3], 2048  }
  0x25   :  { %1195 = vsyncadd [#allocation3], 4294965248 }
  0x26   :  { %1196 = dma.done.wait [#allocation6], 8192  }
  0x27   :  { %1197 = vsyncadd [#allocation6], 4294959104  ;;  %v1739_v0 = vmov 0.0   ;;  %v59_v1 = vld [vmem:[#allocation5 + $0x18] sm:$0xff]  ;;  %v58_v3 = vld [vmem:[#allocation5 + $0x10] sm:$0xff]  ;;  %vm442_vm0 = vcmask 23552  }
  0x28   :  { %345 = vmatprep.mubr.f32.mxu1 %v1739_v0  ;;  %184 = vmatprep.mubr.f32.mxu0 %v1739_v0  ;;  %v63_v2 = vld [vmem:[#allocation5 + $0x38] sm:$0xff]  ;;  %v62_v5 = vld [vmem:[#allocation5 + $0x30] sm:$0xff]  ;;  %v1255_v49 = vld [vmem:[#allocation2] sm:$0xff]  ;;  %s1210_s1 = smov [#allocation7]  }
  0x29   :  { %v973_v4 = vpack.c.bf16 %v63_v2, %v59_v1  ;;  %v67_v6 = vld [vmem:[#allocation5 + $0x58] sm:$0xff]  ;;  %v975_v8 = vpack.c.bf16 %v62_v5, %v58_v3  ;;  %v66_v10 = vld [vmem:[#allocation5 + $0x50] sm:$0xff]  ;;  %v1259_v50 = vld [vmem:[#allocation2 + $0x8] sm:$0xff]  ;;  %s928_s8 = sshll.u32 %s1210_s1, 4  ;;  %s929_s8 = int_to_ptr.vmem [resolvable:$true] %s928_s8 }
  0x2a   :  { %v71_v7 = vld [vmem:[#allocation5 + $0x78] sm:$0xff]  ;;  %v70_v11 = vld [vmem:[#allocation5 + $0x70] sm:$0xff]  ;;  %v1271_v53 = vld [vmem:[#allocation2 + $0x20] sm:$0xff]  ;;  %s1172_s9 = scalar_lea.vmem %s929_s8, 2048  ;;  %p1177_p3 = scmp.lt.s32.totalorder %s929_s8, %s929_s8 }
  0x2b   :  { %v977_v9 = vpack.c.bf16 %v71_v7, %v67_v6  ;;  %v75_v12 = vld [vmem:[#allocation5 + $0x98] sm:$0xff]  ;;  %974 = vmatprep.subr.bf16.mxu1 %v973_v4  ;;  %v979_v14 = vpack.c.bf16 %v70_v11, %v66_v10  ;;  %v74_v16 = vld [vmem:[#allocation5 + $0x90] sm:$0xff]  ;;  %v1275_v54 = vld [vmem:[#allocation2 + $0x28] sm:$0xff]  ;;  %p1173_p2 = scmp.ne.s32.totalorder %s929_s8, %s1172_s9  ;;  %p1178_p4 = scmp.lt.s32.totalorder %s1172_s9, %s1172_s9 }
  0x2c   :  { %v79_v13 = vld [vmem:[#allocation5 + $0xb8] sm:$0xff]  ;;  %976 = vmatpush1.bf16.msra.mxu1 %v975_v8  ;;  %v78_v17 = vld [vmem:[#allocation5 + $0xb0] sm:$0xff]  ;;  %v1287_v57 = vld [vmem:[#allocation2 + $0x40] sm:$0xff] }
  0x2d   :  { %978 = vmatprep.subr.bf16.mxu1 %v977_v9  ;;  %v981_v15 = vpack.c.bf16 %v79_v13, %v75_v12  ;;  %v83_v18 = vld [vmem:[#allocation5 + $0xd8] sm:$0xff]  ;;  %v983_v20 = vpack.c.bf16 %v78_v17, %v74_v16  ;;  %v82_v22 = vld [vmem:[#allocation5 + $0xd0] sm:$0xff]  ;;  %v1291_v58 = vld [vmem:[#allocation2 + $0x48] sm:$0xff]  ;;  %p1179_p5 = por %p1178_p4, %p1177_p3 }
  0x2e   :  { %v87_v19 = vld [vmem:[#allocation5 + $0xf8] sm:$0xff]  ;;  %v86_v23 = vld [vmem:[#allocation5 + $0xf0] sm:$0xff]  ;;  %v1303_v61 = vld [vmem:[#allocation2 + $0x60] sm:$0xff] }
  0x2f   :  { %v985_v21 = vpack.c.bf16 %v87_v19, %v83_v18  ;;  %v91_v24 = vld [vmem:[#allocation5 + $0x118] sm:$0xff]  ;;  %v987_v26 = vpack.c.bf16 %v86_v23, %v82_v22  ;;  %v90_v28 = vld [vmem:[#allocation5 + $0x110] sm:$0xff]  ;;  %v1307_v62 = vld [vmem:[#allocation2 + $0x68] sm:$0xff]  ;;  %p1180_p6 = pnand %p1179_p5, %p1173_p2 }
  0x30   :  { %980 = vmatpush1.bf16.msra.mxu1 %v979_v14  ;;  %v95_v25 = vld [vmem:[#allocation5 + $0x138] sm:$0xff]  ;;  %v94_v29 = vld [vmem:[#allocation5 + $0x130] sm:$0xff] }
  0x31   :  { %982 = vmatprep.subr.bf16.mxu1 %v981_v15  ;;  %v989_v27 = vpack.c.bf16 %v95_v25, %v91_v24  ;;  %v99_v30 = vld [vmem:[#allocation5 + $0x158] sm:$0xff]  ;;  %v991_v32 = vpack.c.bf16 %v94_v29, %v90_v28  ;;  %v98_v34 = vld [vmem:[#allocation5 + $0x150] sm:$0xff] }
  0x32   :  { %v103_v31 = vld [vmem:[#allocation5 + $0x178] sm:$0xff]  ;;  %v102_v35 = vld [vmem:[#allocation5 + $0x170] sm:$0xff] }
  0x33   :  { %v993_v33 = vpack.c.bf16 %v103_v31, %v99_v30  ;;  %v107_v36 = vld [vmem:[#allocation5 + $0x198] sm:$0xff]  ;;  %v995_v38 = vpack.c.bf16 %v102_v35, %v98_v34  ;;  %v106_v40 = vld [vmem:[#allocation5 + $0x190] sm:$0xff] }
  0x34   :  { %984 = vmatpush1.bf16.msra.mxu1 %v983_v20  ;;  %v111_v37 = vld [vmem:[#allocation5 + $0x1b8] sm:$0xff]  ;;  %v110_v41 = vld [vmem:[#allocation5 + $0x1b0] sm:$0xff] }
  0x35   :  { %986 = vmatprep.subr.bf16.mxu1 %v985_v21  ;;  %v997_v39 = vpack.c.bf16 %v111_v37, %v107_v36  ;;  %v115_v42 = vld [vmem:[#allocation5 + $0x1d8] sm:$0xff]  ;;  %v999_v44 = vpack.c.bf16 %v110_v41, %v106_v40  ;;  %v114_v46 = vld [vmem:[#allocation5 + $0x1d0] sm:$0xff] }
  0x36   :  { %v119_v43 = vld [vmem:[#allocation5 + $0x1f8] sm:$0xff]  ;;  %v118_v47 = vld [vmem:[#allocation5 + $0x1f0] sm:$0xff] }
  0x37   :  { %v1001_v45 = vpack.c.bf16 %v119_v43, %v115_v42  ;;  %v1003_v48 = vpack.c.bf16 %v118_v47, %v114_v46  ;;  %v1263_v51 = vld [vmem:[#allocation2 + $0x10] sm:$0xff]  ;;  %v1267_v52 = vld [vmem:[#allocation2 + $0x18] sm:$0xff] }
  0x38   :  { %988 = vmatpush1.bf16.msra.mxu1 %v987_v26  ;;  %v1279_v55 = vld [vmem:[#allocation2 + $0x30] sm:$0xff]  ;;  %v1283_v56 = vld [vmem:[#allocation2 + $0x38] sm:$0xff] }
  0x39   :  { %990 = vmatprep.subr.bf16.mxu1 %v989_v27  ;;  %v1295_v59 = vld [vmem:[#allocation2 + $0x50] sm:$0xff]  ;;  %v1299_v60 = vld [vmem:[#allocation2 + $0x58] sm:$0xff] }
  0x3a   :  { %v1311_v63 = vld [vmem:[#allocation2 + $0x70] sm:$0xff]  ;;  %v1315_v1 = vld [vmem:[#allocation2 + $0x78] sm:$0xff] }
  0x3c   :  { %992 = vmatpush1.bf16.msra.mxu1 %v991_v32 }
  0x3d   :  { %994 = vmatprep.subr.bf16.mxu1 %v993_v33 }
  0x40   :  { %996 = vmatpush1.bf16.msra.mxu1 %v995_v38 }
  0x41   :  { %998 = vmatprep.subr.bf16.mxu1 %v997_v39 }
  0x44   :  { %1000 = vmatpush1.bf16.msra.mxu1 %v999_v44 }
  0x45   :  { %1002 = vmatprep.subr.bf16.mxu1 %v1001_v45 }
  0x48   :  { %1004 = vmatpush1.bf16.msra.mxu1 %v1003_v48 }
  0x4b   :  { %346 = vmatmul.mubr.f32.vlgmr.msra.gmra.mrb[0].mxu1 %v1255_v49 }
  0x4c   :  { %351 = vmatprep.mubr.f32.mxu1 %v1739_v0 }
  0x4f   :  { %352 = vmatmul.mubr.f32.gmra.mrb[2].mxu1 %v1259_v50 }
  0x50   :  { %357 = vmatprep.mubr.f32.mxu1 %v1739_v0 }
  0x53   :  { %358 = vmatmul.mubr.f32.gmra.mrb[4].mxu1 %v1263_v51 }
  0x54   :  { %363 = vmatprep.mubr.f32.mxu1 %v1739_v0 }
  0x57   :  { %364 = vmatmul.mubr.f32.gmra.mrb[6].mxu1 %v1267_v52 }
  0x58   :  { %369 = vmatprep.mubr.f32.mxu1 %v1739_v0 }
  0x5b   :  { %370 = vmatmul.mubr.f32.gmra.mrb[8].mxu1 %v1271_v53 }
  0x5c   :  { %375 = vmatprep.mubr.f32.mxu1 %v1739_v0 }
  0x5f   :  { %376 = vmatmul.mubr.f32.gmra.mrb[10].mxu1 %v1275_v54 }
  0x60   :  { %381 = vmatprep.mubr.f32.mxu1 %v1739_v0 }
  0x63   :  { %382 = vmatmul.mubr.f32.gmra.mrb[12].mxu1 %v1279_v55 }
  0x64   :  { %387 = vmatprep.mubr.f32.mxu1 %v1739_v0 }
  0x67   :  { %388 = vmatmul.mubr.f32.gmra.mrb[14].mxu1 %v1283_v56 }
  0x68   :  { %393 = vmatprep.mubr.f32.mxu1 %v1739_v0 }
  0x6b   :  { %394 = vmatmul.mubr.f32.gmra.mrb[16].mxu1 %v1287_v57 }
  0x6c   :  { %399 = vmatprep.mubr.f32.mxu1 %v1739_v0 }
  0x6f   :  { %400 = vmatmul.mubr.f32.gmra.mrb[18].mxu1 %v1291_v58 }
  0x70   :  { %405 = vmatprep.mubr.f32.mxu1 %v1739_v0 }
  0x73   :  { %406 = vmatmul.mubr.f32.gmra.mrb[20].mxu1 %v1295_v59 }
  0x74   :  { %411 = vmatprep.mubr.f32.mxu1 %v1739_v0 }
  0x77   :  { %412 = vmatmul.mubr.f32.gmra.mrb[22].mxu1 %v1299_v60 }
  0x78   :  { %417 = vmatprep.mubr.f32.mxu1 %v1739_v0 }
  0x7b   :  { %418 = vmatmul.mubr.f32.gmra.mrb[24].mxu1 %v1303_v61 }
  0x7c   :  { %423 = vmatprep.mubr.f32.mxu1 %v1739_v0 }
  0x7f   :  { %424 = vmatmul.mubr.f32.gmra.mrb[26].mxu1 %v1307_v62 }
  0x80   :  { %429 = vmatprep.mubr.f32.mxu1 %v1739_v0 }
  0x83   :  { %430 = vmatmul.mubr.f32.gmra.mrb[28].mxu1 %v1311_v63 }
  0x84   :  { %435 = vmatprep.mubr.f32.mxu1 %v1739_v0 }
  0x87   :  { %436 = vmatmul.mubr.f32.gmra.mrb[30].mxu1 %v1315_v1 }
 0x11e   :  { %v1318_v2 = vpop.f32.mrb[0].mxu1 }
 0x11f   :  { %v1320_v3 = vpop.f32.mrb[1].mxu1 }
 0x120   :  { %v443_v4 = vsel %vm442_vm0, %v1320_v3, -inf }
 0x121   :  { %444 = vmax.xlane.f32.xlu0 %v443_v4 }
 0x122   :  { %v1324_v5 = vpop.f32.mrb[2].mxu1 }
 0x123   :  { %v1326_v6 = vpop.f32.mrb[3].mxu1 }
 0x124   :  { %v446_v7 = vsel %vm442_vm0, %v1326_v6, -inf }
 0x125   :  { %447 = vmax.xlane.f32.xlu0 %v446_v7  ;;  %v57_v7 = vld [vmem:[#allocation5 + $0x8] sm:$0xff] }
 0x126   :  { %v1330_v8 = vpop.f32.mrb[4].mxu1 }
 0x127   :  { %v1332_v9 = vpop.f32.mrb[5].mxu1 }
 0x128   :  { %v449_v10 = vsel %vm442_vm0, %v1332_v9, -inf }
 0x129   :  { %450 = vmax.xlane.f32.xlu1 %v449_v10  ;;  %v61_v10 = vld [vmem:[#allocation5 + $0x28] sm:$0xff] }
 0x12a   :  { %v1336_v11 = vpop.f32.mrb[6].mxu1 }
 0x12b   :  { %v1338_v12 = vpop.f32.mrb[7].mxu1 }
 0x12c   :  { %v452_v13 = vsel %vm442_vm0, %v1338_v12, -inf }
 0x12d   :  { %453 = vmax.xlane.f32.xlu1 %v452_v13  ;;  %v941_v13 = vpack.c.bf16 %v61_v10, %v57_v7  ;;  %v81_v7 = vld [vmem:[#allocation5 + $0xc8] sm:$0xff] }
 0x12e   :  { %v1342_v14 = vpop.f32.mrb[8].mxu1  ;;  %v85_v10 = vld [vmem:[#allocation5 + $0xe8] sm:$0xff] }
 0x12f   :  { %v1344_v15 = vpop.f32.mrb[9].mxu1  ;;  %942 = vmatprep.subr.bf16.mxu0 %v941_v13  ;;  %v953_v13 = vpack.c.bf16 %v85_v10, %v81_v7  ;;  %v105_v7 = vld [vmem:[#allocation5 + $0x188] sm:$0xff] }
 0x130   :  { %v455_v16 = vsel %vm442_vm0, %v1344_v15, -inf  ;;  %v109_v10 = vld [vmem:[#allocation5 + $0x1a8] sm:$0xff] }
 0x131   :  { %456 = vmax.xlane.f32.xlu0 %v455_v16  ;;  %v56_v16 = vld [vmem:[#allocation5] sm:$0xff] }
 0x132   :  { %v1348_v17 = vpop.f32.mrb[10].mxu1 }
 0x133   :  { %v1350_v18 = vpop.f32.mrb[11].mxu1 }
 0x134   :  { %v458_v19 = vsel %vm442_vm0, %v1350_v18, -inf }
 0x135   :  { %459 = vmax.xlane.f32.xlu1 %v458_v19  ;;  %v60_v19 = vld [vmem:[#allocation5 + $0x20] sm:$0xff] }
 0x136   :  { %v1354_v20 = vpop.f32.mrb[12].mxu1 }
 0x137   :  { %v1356_v21 = vpop.f32.mrb[13].mxu1 }
 0x138   :  { %v461_v22 = vsel %vm442_vm0, %v1356_v21, -inf }
 0x139   :  { %462 = vmax.xlane.f32.xlu0 %v461_v22  ;;  %v943_v22 = vpack.c.bf16 %v60_v19, %v56_v16  ;;  %v80_v16 = vld [vmem:[#allocation5 + $0xc0] sm:$0xff] }
 0x13a   :  { %v1360_v23 = vpop.f32.mrb[14].mxu1  ;;  %v84_v19 = vld [vmem:[#allocation5 + $0xe0] sm:$0xff] }
 0x13b   :  { %v1362_v24 = vpop.f32.mrb[15].mxu1  ;;  %944 = vmatpush1.bf16.msra.mxu0 %v943_v22  ;;  %v955_v22 = vpack.c.bf16 %v84_v19, %v80_v16  ;;  %v104_v16 = vld [vmem:[#allocation5 + $0x180] sm:$0xff] }
 0x13c   :  { %v464_v25 = vsel %vm442_vm0, %v1362_v24, -inf  ;;  %v108_v19 = vld [vmem:[#allocation5 + $0x1a0] sm:$0xff] }
 0x13d   :  { %465 = vmax.xlane.f32.xlu1 %v464_v25  ;;  %v65_v25 = vld [vmem:[#allocation5 + $0x48] sm:$0xff] }
 0x13e   :  { %v1366_v26 = vpop.f32.mrb[16].mxu1 }
 0x13f   :  { %v1368_v27 = vpop.f32.mrb[17].mxu1 }
 0x140   :  { %v467_v28 = vsel %vm442_vm0, %v1368_v27, -inf }
 0x141   :  { %468 = vmax.xlane.f32.xlu0 %v467_v28  ;;  %v69_v28 = vld [vmem:[#allocation5 + $0x68] sm:$0xff] }
 0x142   :  { %v1372_v29 = vpop.f32.mrb[18].mxu1 }
 0x143   :  { %v1374_v30 = vpop.f32.mrb[19].mxu1 }
 0x144   :  { %v470_v31 = vsel %vm442_vm0, %v1374_v30, -inf }
 0x145   :  { %471 = vmax.xlane.f32.xlu1 %v470_v31  ;;  %v945_v31 = vpack.c.bf16 %v69_v28, %v65_v25  ;;  %v89_v25 = vld [vmem:[#allocation5 + $0x108] sm:$0xff] }
 0x146   :  { %v1378_v32 = vpop.f32.mrb[20].mxu1  ;;  %v93_v28 = vld [vmem:[#allocation5 + $0x128] sm:$0xff] }
 0x147   :  { %v1380_v33 = vpop.f32.mrb[21].mxu1  ;;  %946 = vmatprep.subr.bf16.mxu0 %v945_v31  ;;  %v957_v31 = vpack.c.bf16 %v93_v28, %v89_v25  ;;  %v967_v25 = vpack.c.bf16 %v108_v19, %v104_v16  ;;  %v117_v28 = vld [vmem:[#allocation5 + $0x1e8] sm:$0xff] }
 0x148   :  { %v473_v34 = vsel %vm442_vm0, %v1380_v33, -inf }
 0x149   :  { %474 = vmax.xlane.f32.xlu0 %v473_v34  ;;  %v64_v34 = vld [vmem:[#allocation5 + $0x40] sm:$0xff] }
 0x14a   :  { %v1384_v35 = vpop.f32.mrb[22].mxu1 }
 0x14b   :  { %v1386_v36 = vpop.f32.mrb[23].mxu1 }
 0x14c   :  { %v476_v37 = vsel %vm442_vm0, %v1386_v36, -inf }
 0x14d   :  { %477 = vmax.xlane.f32.xlu1 %v476_v37  ;;  %v68_v37 = vld [vmem:[#allocation5 + $0x60] sm:$0xff] }
 0x14e   :  { %v1390_v38 = vpop.f32.mrb[24].mxu1 }
 0x14f   :  { %v1392_v39 = vpop.f32.mrb[25].mxu1 }
 0x150   :  { %v479_v40 = vsel %vm442_vm0, %v1392_v39, -inf }
 0x151   :  { %480 = vmax.xlane.f32.xlu0 %v479_v40  ;;  %v947_v40 = vpack.c.bf16 %v68_v37, %v64_v34  ;;  %v88_v34 = vld [vmem:[#allocation5 + $0x100] sm:$0xff] }
 0x152   :  { %v1396_v41 = vpop.f32.mrb[26].mxu1  ;;  %v92_v37 = vld [vmem:[#allocation5 + $0x120] sm:$0xff] }
 0x153   :  { %1741 = vst [vmem:[#allocation11_spill] sm:$0xff] %v1396_v41  ;;  %v1398_v42 = vpop.f32.mrb[27].mxu1  ;;  %948 = vmatpush1.bf16.msra.mxu0 %v947_v40  ;;  %v959_v40 = vpack.c.bf16 %v92_v37, %v88_v34  ;;  %v112_v41 = vld [vmem:[#allocation5 + $0x1c0] sm:$0xff] }
 0x154   :  { %v482_v43 = vsel %vm442_vm0, %v1398_v42, -inf  ;;  %v116_v34 = vld [vmem:[#allocation5 + $0x1e0] sm:$0xff] }
 0x155   :  { %483 = vmax.xlane.f32.xlu1 %v482_v43  ;;  %v73_v43 = vld [vmem:[#allocation5 + $0x88] sm:$0xff]  ;;  %v971_v37 = vpack.c.bf16 %v116_v34, %v112_v41 }
 0x156   :  { %v1402_v44 = vpop.f32.mrb[28].mxu1 }
 0x157   :  { %1742 = vst [vmem:[#allocation12_spill] sm:$0xff] %v1402_v44  ;;  %v1404_v45 = vpop.f32.mrb[29].mxu1  ;;  %v76_v44 = vld [vmem:[#allocation5 + $0xa0] sm:$0xff] }
 0x158   :  { %v485_v46 = vsel %vm442_vm0, %v1404_v45, -inf }
 0x159   :  { %486 = vmax.xlane.f32.xlu0 %v485_v46  ;;  %v77_v46 = vld [vmem:[#allocation5 + $0xa8] sm:$0xff] }
 0x15a   :  { %v1408_v47 = vpop.f32.mrb[30].mxu1  ;;  %v949_v0 = vpack.c.bf16 %v77_v46, %v73_v43  ;;  %v97_v43 = vld [vmem:[#allocation5 + $0x148] sm:$0xff]  ;;  %v100_v46 = vld [vmem:[#allocation5 + $0x160] sm:$0xff] }
 0x15b   :  { %1743 = vst [vmem:[#allocation13_spill] sm:$0xff] %v1408_v47  ;;  %v1410_v48 = vpop.f32.mrb[31].mxu1 }
 0x15c   :  { %v488_v4 = vsel %vm442_vm0, %v1410_v48, -inf  ;;  %950 = vmatprep.subr.bf16.mxu0 %v949_v0 }
 0x15d   :  { %489 = vmax.xlane.f32.xlu1 %v488_v4  ;;  %v72_v4 = vld [vmem:[#allocation5 + $0x80] sm:$0xff] }
 0x15e   :  { %v951_v47 = vpack.c.bf16 %v76_v44, %v72_v4  ;;  %v101_v44 = vld [vmem:[#allocation5 + $0x168] sm:$0xff] }
 0x15f   :  { %v961_v0 = vpack.c.bf16 %v101_v44, %v97_v43 }
 0x160   :  { %952 = vmatpush1.bf16.msra.mxu0 %v951_v47  ;;  %v96_v47 = vld [vmem:[#allocation5 + $0x140] sm:$0xff] }
 0x161   :  { %954 = vmatprep.subr.bf16.mxu0 %v953_v13  ;;  %v963_v4 = vpack.c.bf16 %v100_v46, %v96_v47  ;;  %v965_v13 = vpack.c.bf16 %v109_v10, %v105_v7 }
 0x164   :  { %956 = vmatpush1.bf16.msra.mxu0 %v955_v22  ;;  %v113_v22 = vld [vmem:[#allocation5 + $0x1c8] sm:$0xff] }
 0x165   :  { %958 = vmatprep.subr.bf16.mxu0 %v957_v31  ;;  %v969_v31 = vpack.c.bf16 %v117_v28, %v113_v22 }
 0x168   :  { %960 = vmatpush1.bf16.msra.mxu0 %v959_v40  ;;  %v1744_v40 = vmov 0.0  }
 0x169   :  { %962 = vmatprep.subr.bf16.mxu0 %v961_v0 }
 0x16c   :  { %964 = vmatpush1.bf16.msra.mxu0 %v963_v4 }
 0x16d   :  { %966 = vmatprep.subr.bf16.mxu0 %v965_v13 }
 0x170   :  { %968 = vmatpush1.bf16.msra.mxu0 %v967_v25 }
 0x171   :  { %970 = vmatprep.subr.bf16.mxu0 %v969_v31 }
 0x174   :  { %972 = vmatpush1.bf16.msra.mxu0 %v971_v37 }
 0x177   :  { %185 = vmatmul.mubr.f32.vlgmr.msra.gmra.mrb[0].mxu0 %v1255_v49 }
 0x178   :  { %190 = vmatprep.mubr.f32.mxu0 %v1744_v40 }
 0x17b   :  { %191 = vmatmul.mubr.f32.gmra.mrb[2].mxu0 %v1259_v50 }
 0x17c   :  { %196 = vmatprep.mubr.f32.mxu0 %v1744_v40 }
 0x17f   :  { %197 = vmatmul.mubr.f32.gmra.mrb[4].mxu0 %v1263_v51 }
 0x180   :  { %202 = vmatprep.mubr.f32.mxu0 %v1744_v40 }
 0x183   :  { %203 = vmatmul.mubr.f32.gmra.mrb[6].mxu0 %v1267_v52 }
 0x184   :  { %208 = vmatprep.mubr.f32.mxu0 %v1744_v40 }
 0x187   :  { %209 = vmatmul.mubr.f32.gmra.mrb[8].mxu0 %v1271_v53 }
 0x188   :  { %214 = vmatprep.mubr.f32.mxu0 %v1744_v40 }
 0x18b   :  { %215 = vmatmul.mubr.f32.gmra.mrb[10].mxu0 %v1275_v54 }
 0x18c   :  { %220 = vmatprep.mubr.f32.mxu0 %v1744_v40 }
 0x18f   :  { %221 = vmatmul.mubr.f32.gmra.mrb[12].mxu0 %v1279_v55 }
 0x190   :  { %226 = vmatprep.mubr.f32.mxu0 %v1744_v40 }
 0x193   :  { %227 = vmatmul.mubr.f32.gmra.mrb[14].mxu0 %v1283_v56 }
 0x194   :  { %232 = vmatprep.mubr.f32.mxu0 %v1744_v40 }
 0x197   :  { %233 = vmatmul.mubr.f32.gmra.mrb[16].mxu0 %v1287_v57 }
 0x198   :  { %238 = vmatprep.mubr.f32.mxu0 %v1744_v40 }
 0x19b   :  { %239 = vmatmul.mubr.f32.gmra.mrb[18].mxu0 %v1291_v58 }
 0x19c   :  { %244 = vmatprep.mubr.f32.mxu0 %v1744_v40 }
 0x19f   :  { %245 = vmatmul.mubr.f32.gmra.mrb[20].mxu0 %v1295_v59 }
 0x1a0   :  { %250 = vmatprep.mubr.f32.mxu0 %v1744_v40 }
 0x1a3   :  { %251 = vmatmul.mubr.f32.gmra.mrb[22].mxu0 %v1299_v60 }
 0x1a4   :  { %256 = vmatprep.mubr.f32.mxu0 %v1744_v40 }
 0x1a7   :  { %257 = vmatmul.mubr.f32.gmra.mrb[24].mxu0 %v1303_v61 }
 0x1a8   :  { %262 = vmatprep.mubr.f32.mxu0 %v1744_v40 }
 0x1ab   :  { %263 = vmatmul.mubr.f32.gmra.mrb[26].mxu0 %v1307_v62 }
 0x1ac   :  { %268 = vmatprep.mubr.f32.mxu0 %v1744_v40 }
 0x1ae   :  { %v445_v49 = vpop.xlane.xlu0 %444 }
 0x1af   :  { %v491_v50 = vsub.f32 %v1320_v3, %v445_v49  ;;  %269 = vmatmul.mubr.f32.gmra.mrb[28].mxu0 %v1311_v63 }
 0x1b0   :  { %274 = vmatprep.mubr.f32.mxu0 %v1744_v40 }
 0x1b1   :  { %v507_v51 = vmul.f32 1.442695, %v491_v50 }
 0x1b2   :  { %v448_v52 = vpop.xlane.xlu0 %447 }
 0x1b3   :  { %1064 = vpow2.f32 %v507_v51  ;;  %v492_v53 = vsub.f32 %v1326_v6, %v448_v52  ;;  %275 = vmatmul.mubr.f32.gmra.mrb[30].mxu0 %v1315_v1 }
 0x1b5   :  { %v509_v54 = vmul.f32 1.442695, %v492_v53  ;;  %v1207_v53 = vmov 1  }
 0x1b6   :  { %v451_v55 = vpop.xlane.xlu1 %450  ;;  %1017 = vset.pattern.permute.xlu1 %v1207_v53 }
 0x1b7   :  { %1066 = vpow2.f32 %v509_v54  ;;  %v493_v56 = vsub.f32 %v1332_v9, %v451_v55  ;;  %v1208_v54 = vmov 0  }
 0x1b8   :  { %1016 = vset.pattern.permute.xlu0 %v1208_v54 }
 0x1b9   :  { %v511_v57 = vmul.f32 1.442695, %v493_v56 }
 0x1ba   :  { %v454_v58 = vpop.xlane.xlu1 %453 }
 0x1bb   :  { %1068 = vpow2.f32 %v511_v57  ;;  %v494_v59 = vsub.f32 %v1338_v12, %v454_v58 }
 0x1bd   :  { %v1446_v60 = vpop.eup %1064  ;;  %v513_v3 = vmul.f32 1.442695, %v494_v59 }
 0x1be   :  { %v457_v61 = vpop.xlane.xlu0 %456  ;;  %v539_v6 = vsel %vm442_vm0, %v1446_v60, 0.0 }
 0x1bf   :  { %1070 = vpow2.f32 %v513_v3  ;;  %v495_v62 = vsub.f32 %v1344_v15, %v457_v61  ;;  %540 = vadd.xlane.f32.xlu0 %v539_v6 }
 0x1c1   :  { %v1453_v9 = vpop.eup %1066  ;;  %v515_v41 = vmul.f32 1.442695, %v495_v62 }
 0x1c2   :  { %v460_v12 = vpop.xlane.xlu1 %459  ;;  %v542_v43 = vsel %vm442_vm0, %v1453_v9, 0.0 }
 0x1c3   :  { %1072 = vpow2.f32 %v515_v41  ;;  %v496_v63 = vsub.f32 %v1350_v18, %v460_v12  ;;  %543 = vadd.xlane.f32.xlu1 %v542_v43 }
 0x1c5   :  { %v1459_v44 = vpop.eup %1068  ;;  %v517_v0 = vmul.f32 1.442695, %v496_v63 }
 0x1c6   :  { %v463_v47 = vpop.xlane.xlu0 %462  ;;  %v545_v15 = vsel %vm442_vm0, %v1459_v44, 0.0 }
 0x1c7   :  { %1074 = vpow2.f32 %v517_v0  ;;  %v497_v46 = vsub.f32 %v1356_v21, %v463_v47  ;;  %546 = vadd.xlane.f32.xlu0 %v545_v15 }
 0x1c9   :  { %v1464_v1 = vpop.eup %1070  ;;  %v519_v4 = vmul.f32 1.442695, %v497_v46 }
 0x1ca   :  { %v466_v7 = vpop.xlane.xlu1 %465  ;;  %v548_v10 = vsel %vm442_vm0, %v1464_v1, 0.0 }
 0x1cb   :  { %1076 = vpow2.f32 %v519_v4  ;;  %v498_v18 = vsub.f32 %v1362_v24, %v466_v7  ;;  %549 = vadd.xlane.f32.xlu1 %v548_v10 }
 0x1cd   :  { %v1469_v13 = vpop.eup %1072  ;;  %v521_v16 = vmul.f32 1.442695, %v498_v18 }
 0x1ce   :  { %v469_v19 = vpop.xlane.xlu0 %468  ;;  %v551_v22 = vsel %vm442_vm0, %v1469_v13, 0.0 }
 0x1cf   :  { %1078 = vpow2.f32 %v521_v16  ;;  %v499_v21 = vsub.f32 %v1368_v27, %v469_v19  ;;  %552 = vadd.xlane.f32.xlu0 %v551_v22 }
 0x1d1   :  { %v1474_v25 = vpop.eup %1074  ;;  %v523_v28 = vmul.f32 1.442695, %v499_v21 }
 0x1d2   :  { %v472_v34 = vpop.xlane.xlu1 %471  ;;  %v554_v31 = vsel %vm442_vm0, %v1474_v25, 0.0 }
 0x1d3   :  { %1080 = vpow2.f32 %v523_v28  ;;  %v500_v24 = vsub.f32 %v1374_v30, %v472_v34  ;;  %555 = vadd.xlane.f32.xlu1 %v554_v31 }
 0x1d5   :  { %v1479_v37 = vpop.eup %1076  ;;  %v525_v40 = vmul.f32 1.442695, %v500_v24 }
 0x1d6   :  { %v475_v49 = vpop.xlane.xlu0 %474  ;;  %v557_v50 = vsel %vm442_vm0, %v1479_v37, 0.0 }
 0x1d7   :  { %1082 = vpow2.f32 %v525_v40  ;;  %v501_v27 = vsub.f32 %v1380_v33, %v475_v49  ;;  %558 = vadd.xlane.f32.xlu0 %v557_v50 }
 0x1d9   :  { %v1484_v51 = vpop.eup %1078  ;;  %v527_v52 = vmul.f32 1.442695, %v501_v27 }
 0x1da   :  { %v478_v30 = vpop.xlane.xlu1 %477  ;;  %v560_v55 = vsel %vm442_vm0, %v1484_v51, 0.0 }
 0x1db   :  { %1084 = vpow2.f32 %v527_v52  ;;  %v502_v56 = vsub.f32 %v1386_v36, %v478_v30  ;;  %561 = vadd.xlane.f32.xlu1 %v560_v55 }
 0x1dd   :  { %v1491_v57 = vpop.eup %1080  ;;  %v529_v33 = vmul.f32 1.442695, %v502_v56  ;;  %v1209_v56 = vmov 2  }
 0x1de   :  { %v481_v58 = vpop.xlane.xlu0 %480  ;;  %v563_v59 = vsel %vm442_vm0, %v1491_v57, 0.0 }
 0x1df   :  { %1086 = vpow2.f32 %v529_v33  ;;  %v503_v3 = vsub.f32 %v1392_v39, %v481_v58  ;;  %564 = vadd.xlane.f32.xlu0 %v563_v59 }
 0x1e1   :  { %v1496_v61 = vpop.eup %1082  ;;  %v531_v6 = vmul.f32 1.442695, %v503_v3 }
 0x1e2   :  { %v484_v62 = vpop.xlane.xlu1 %483  ;;  %v566_v41 = vsel %vm442_vm0, %v1496_v61, 0.0 }
 0x1e3   :  { %1088 = vpow2.f32 %v531_v6  ;;  %v504_v36 = vsub.f32 %v1398_v42, %v484_v62  ;;  %567 = vadd.xlane.f32.xlu1 %v566_v41 }
 0x1e5   :  { %v1501_v12 = vpop.eup %1084  ;;  %v533_v43 = vmul.f32 1.442695, %v504_v36 }
 0x1e6   :  { %v487_v63 = vpop.xlane.xlu0 %486  ;;  %v569_v0 = vsel %vm442_vm0, %v1501_v12, 0.0 }
 0x1e7   :  { %1090 = vpow2.f32 %v533_v43  ;;  %v505_v39 = vsub.f32 %v1404_v45, %v487_v63  ;;  %570 = vadd.xlane.f32.xlu0 %v569_v0 }
 0x1e9   :  { %v1506_v47 = vpop.eup %1086  ;;  %v535_v15 = vmul.f32 1.442695, %v505_v39 }
 0x1ea   :  { %v490_v46 = vpop.xlane.xlu1 %489  ;;  %v572_v4 = vsel %vm442_vm0, %v1506_v47, 0.0 }
 0x1eb   :  { %1092 = vpow2.f32 %v535_v15  ;;  %v506_v42 = vsub.f32 %v1410_v48, %v490_v46  ;;  %573 = vadd.xlane.f32.xlu1 %v572_v4 }
 0x1ed   :  { %v1511_v7 = vpop.eup %1088  ;;  %v537_v10 = vmul.f32 1.442695, %v506_v42 }
 0x1ee   :  { %v575_v18 = vsel %vm442_vm0, %v1511_v7, 0.0 }
 0x1ef   :  { %1094 = vpow2.f32 %v537_v10  ;;  %576 = vadd.xlane.f32.xlu0 %v575_v18 }
 0x1f1   :  { %v1515_v45 = vpop.eup %1090 }
 0x1f2   :  { %v578_v16 = vsel %vm442_vm0, %v1515_v45, 0.0 }
 0x1f3   :  { %579 = vadd.xlane.f32.xlu1 %v578_v16 }
 0x1f5   :  { %v1519_v19 = vpop.eup %1092 }
 0x1f6   :  { %v581_v48 = vsel %vm442_vm0, %v1519_v19, 0.0 }
 0x1f7   :  { %582 = vadd.xlane.f32.xlu0 %v581_v48 }
 0x1f9   :  { %v1523_v22 = vpop.eup %1094 }
 0x1fa   :  { %v584_v21 = vsel %vm442_vm0, %v1523_v22, 0.0 }
 0x1fb   :  { %585 = vadd.xlane.f32.xlu1 %v584_v21 }
 0x24a   :  { %v1528_v50 = vpop.f32.mrb[0].mxu0 }
 0x24b   :  { %v1530_v27 = vpop.f32.mrb[1].mxu0 }
 0x24c   :  { %v541_v28 = vpop.xlane.xlu0 %540 }
 0x24d   :  { %1096 = vrcp.f32 %v541_v28 }
 0x24e   :  { %v1535_v33 = vpop.f32.mrb[2].mxu0 }
 0x24f   :  { %v1539_v59 = vpop.f32.mrb[3].mxu0 }
 0x250   :  { %v544_v34 = vpop.xlane.xlu1 %543 }
 0x251   :  { %1098 = vrcp.f32 %v544_v34 }
 0x252   :  { %v1545_v41 = vpop.f32.mrb[4].mxu0 }
 0x253   :  { %v1547_v43 = vpop.f32.mrb[5].mxu0 }
 0x254   :  { %v547_v31 = vpop.xlane.xlu0 %546 }
 0x255   :  { %1100 = vrcp.f32 %v547_v31 }
 0x256   :  { %v1549_v63 = vpop.f32.mrb[6].mxu0 }
 0x257   :  { %v1097_v24 = vpop.eup %1096  ;;  %v1551_v39 = vpop.f32.mrb[7].mxu0 }
 0x258   :  { %v550_v40 = vpop.xlane.xlu1 %549  ;;  %v603_v49 = vmul.f32 %v1097_v24, %v1446_v60 }
 0x259   :  { %1102 = vrcp.f32 %v550_v40 }
 0x25a   :  { %621 = vperm.xlu0 %1016, %v603_v49   ;;  %716 = vperm.xlu1 %1017, %v603_v49  }
 0x25b   :  { %v1099_v52 = vpop.eup %1098 }
 0x25c   :  { %v553_v30 = vpop.xlane.xlu0 %552  ;;  %v604_v55 = vmul.f32 %v1099_v52, %v1453_v9 }
 0x25d   :  { %1104 = vrcp.f32 %v553_v30 }
 0x25e   :  { %1018 = vset.pattern.permute.xlu0 %v1209_v56  ;;  %1019 = vset.pattern.permute.xlu1 %v1208_v54 }
 0x25f   :  { %812 = vperm.xlu0 %1018, %v603_v49   ;;  %626 = vperm.xlu1 %1019, %v604_v55   ;;  %v1101_v58 = vpop.eup %1100 }
 0x260   :  { %v556_v60 = vpop.xlane.xlu1 %555  ;;  %v605_v6 = vmul.f32 %v1101_v58, %v1459_v44 }
 0x261   :  { %1106 = vrcp.f32 %v556_v60 }
 0x263   :  { %1020 = vset.pattern.permute.xlu0 %v1207_v53  ;;  %1021 = vset.pattern.permute.xlu1 %v1209_v56  ;;  %v1103_v3 = vpop.eup %1102 }
 0x264   :  { %720 = vperm.xlu0 %1020, %v604_v55   ;;  %816 = vperm.xlu1 %1021, %v604_v55   ;;  %v559_v9 = vpop.xlane.xlu0 %558  ;;  %v606_v62 = vmul.f32 %v1103_v3, %v1464_v1  ;;  %v1554_v1 = vpop.f32.mrb[8].mxu0 }
 0x265   :  { %1108 = vrcp.f32 %v559_v9  ;;  %v1558_v15 = vpop.f32.mrb[9].mxu0 }
 0x266   :  { %v1563_v10 = vpop.f32.mrb[10].mxu0 }
 0x267   :  { %v1105_v36 = vpop.eup %1104  ;;  %v1565_v16 = vpop.f32.mrb[11].mxu0 }
 0x268   :  { %1027 = vset.pattern.permute.xlu0 %v1209_v56  ;;  %1022 = vset.pattern.permute.xlu1 %v1208_v54  ;;  %v562_v0 = vpop.xlane.xlu1 %561  ;;  %v607_v44 = vmul.f32 %v1105_v36, %v1469_v13  ;;  %v1568_v21 = vpop.f32.mrb[12].mxu0 }
 0x269   :  { %631 = vperm.xlu1 %1022, %v605_v6   ;;  %824 = vperm.xlu0 %1027, %v606_v62   ;;  %1110 = vrcp.f32 %v562_v0 }
 0x26b   :  { %v1107_v46 = vpop.eup %1106 }
 0x26c   :  { %v565_v4 = vpop.xlane.xlu0 %564  ;;  %v608_v42 = vmul.f32 %v1107_v46, %v1474_v25  ;;  %v1572_v25 = vpop.f32.mrb[13].mxu0 }
 0x26d   :  { %1023 = vset.pattern.permute.xlu1 %v1207_v53  ;;  %1029 = vset.pattern.permute.xlu0 %v1207_v53  ;;  %1112 = vrcp.f32 %v565_v4  ;;  %v1580_v31 = vpop.f32.mrb[14].mxu0 }
 0x26e   :  { %724 = vperm.xlu1 %1023, %v605_v6   ;;  %732 = vperm.xlu0 %1029, %v607_v44   ;;  %v1582_v40 = vpop.f32.mrb[15].mxu0 }
 0x26f   :  { %v1109_v13 = vpop.eup %1108  ;;  %v1587_v52 = vpop.f32.mrb[16].mxu0 }
 0x270   :  { %v568_v18 = vpop.xlane.xlu1 %567  ;;  %v609_v48 = vmul.f32 %v1109_v13, %v1479_v37 }
 0x271   :  { %1114 = vrcp.f32 %v568_v18 }
 0x272   :  { %1024 = vset.pattern.permute.xlu1 %v1209_v56  ;;  %1033 = vset.pattern.permute.xlu0 %v1209_v56 }
 0x273   :  { %820 = vperm.xlu1 %1024, %v605_v6   ;;  %832 = vperm.xlu0 %1033, %v608_v42   ;;  %v1111_v28 = vpop.eup %1110 }
 0x274   :  { %v1575_v34 = vmul.f32 %v1111_v28, %v1484_v51  ;;  %v571_v24 = vpop.xlane.xlu0 %570  ;;  %v1591_v51 = vpop.f32.mrb[17].mxu0 }
 0x275   :  { %1116 = vrcp.f32 %v571_v24 }
 0x277   :  { %1025 = vset.pattern.permute.xlu1 %v1208_v54  ;;  %1035 = vset.pattern.permute.xlu0 %v1207_v53  ;;  %v1113_v37 = vpop.eup %1112 }
 0x278   :  { %636 = vperm.xlu1 %1025, %v606_v62   ;;  %740 = vperm.xlu0 %1035, %v609_v48   ;;  %v1585_v49 = vmul.f32 %v1113_v37, %v1491_v57  ;;  %v574_v55 = vpop.xlane.xlu1 %573  ;;  %v1599_v57 = vpop.f32.mrb[18].mxu0 }
 0x279   :  { %1118 = vrcp.f32 %v574_v55 }
 0x27b   :  { %v1115_v30 = vpop.eup %1114 }
 0x27c   :  { %1026 = vset.pattern.permute.xlu1 %v1207_v53  ;;  %1039 = vset.pattern.permute.xlu0 %v1209_v56  ;;  %v1595_v60 = vmul.f32 %v1115_v30, %v1496_v61  ;;  %v1605_v61 = vpop.f32.mrb[19].mxu0  ;;  %v577_v9 = vpop.xlane.xlu0 %576 }
 0x27d   :  { %728 = vperm.xlu1 %1026, %v606_v62   ;;  %840 = vperm.xlu0 %1039, %v1575_v34   ;;  %v1607_v3 = vpop.f32.mrb[20].mxu0  ;;  %1120 = vrcp.f32 %v577_v9 }
 0x27e   :  { %v1614_v62 = vpop.f32.mrb[21].mxu0 }
 0x27f   :  { %v1117_v58 = vpop.eup %1116 }
 0x280   :  { %v1610_v6 = vmul.f32 %v1117_v58, %v1501_v12  ;;  %v580_v0 = vpop.xlane.xlu1 %579  ;;  %v1620_v12 = vpop.f32.mrb[22].mxu0 }
 0x281   :  { %1028 = vset.pattern.permute.xlu1 %v1208_v54  ;;  %1041 = vset.pattern.permute.xlu0 %v1207_v53  ;;  %1122 = vrcp.f32 %v580_v0 }
 0x282   :  { %641 = vperm.xlu1 %1028, %v607_v44   ;;  %748 = vperm.xlu0 %1041, %v1585_v49  }
 0x283   :  { %v1119_v36 = vpop.eup %1118 }
 0x284   :  { %v583_v4 = vpop.xlane.xlu0 %582 }
 0x285   :  { %1124 = vrcp.f32 %v583_v4 }
 0x286   :  { %1030 = vset.pattern.permute.xlu1 %v1209_v56  ;;  %1043 = vset.pattern.permute.xlu0 %v1208_v54 }
 0x287   :  { %828 = vperm.xlu1 %1030, %v607_v44   ;;  %666 = vperm.xlu0 %1043, %v1595_v60   ;;  %v614_v44 = vmul.f32 %v1119_v36, %v1506_v47  ;;  %v1121_v46 = vpop.eup %1120 }
 0x288   :  { %v615_v47 = vmul.f32 %v1121_v46, %v1511_v7 }
 0x28b   :  { %1031 = vset.pattern.permute.xlu1 %v1208_v54  ;;  %1045 = vset.pattern.permute.xlu0 %v1209_v56  ;;  %v1123_v28 = vpop.eup %1122 }
 0x28c   :  { %646 = vperm.xlu1 %1031, %v608_v42   ;;  %848 = vperm.xlu0 %1045, %v1595_v60   ;;  %v616_v37 = vmul.f32 %v1123_v28, %v1515_v45 }
 0x28f   :  { %v1125_v24 = vpop.eup %1124 }
 0x290   :  { %1032 = vset.pattern.permute.xlu1 %v1207_v53  ;;  %1047 = vset.pattern.permute.xlu0 %v1207_v53  ;;  %v617_v45 = vmul.f32 %v1125_v24, %v1519_v19 }
 0x291   :  { %736 = vperm.xlu1 %1032, %v608_v42   ;;  %756 = vperm.xlu0 %1047, %v1610_v6   ;;  %v1624_v42 = vpop.f32.mrb[23].mxu0 }
 0x292   :  { %v1627_v13 = vpop.f32.mrb[24].mxu0 }
 0x293   :  { %v1631_v18 = vpop.f32.mrb[25].mxu0 }
 0x294   :  { %v1637_v7 = vpop.f32.mrb[26].mxu0 }
 0x295   :  { %1034 = vset.pattern.permute.xlu1 %v1208_v54  ;;  %1049 = vset.pattern.permute.xlu0 %v1208_v54  ;;  %v1643_v30 = vpop.f32.mrb[27].mxu0 }
 0x296   :  { %651 = vperm.xlu1 %1034, %v609_v48   ;;  %676 = vperm.xlu0 %1049, %v614_v44   ;;  %v1646_v55 = vpop.f32.mrb[28].mxu0 }
 0x29a   :  { %1036 = vset.pattern.permute.xlu1 %v1209_v56  ;;  %1051 = vset.pattern.permute.xlu0 %v1209_v56 }
 0x29b   :  { %836 = vperm.xlu1 %1036, %v609_v48   ;;  %856 = vperm.xlu0 %1051, %v614_v44   ;;  %v586_v48 = vpop.xlane.xlu1 %585 }
 0x29c   :  { %1126 = vrcp.f32 %v586_v48 }
 0x29f   :  { %1037 = vset.pattern.permute.xlu1 %v1208_v54  ;;  %1053 = vset.pattern.permute.xlu0 %v1207_v53 }
 0x2a0   :  { %656 = vperm.xlu1 %1037, %v1575_v34   ;;  %764 = vperm.xlu0 %1053, %v615_v47  }
 0x2a4   :  { %1038 = vset.pattern.permute.xlu1 %v1207_v53  ;;  %1055 = vset.pattern.permute.xlu0 %v1208_v54 }
 0x2a5   :  { %744 = vperm.xlu1 %1038, %v1575_v34   ;;  %686 = vperm.xlu0 %1055, %v616_v37   ;;  %v1650_v34 = vpop.f32.mrb[29].mxu0 }
 0x2a6   :  { %v1127_v58 = vpop.eup %1126  ;;  %v1656_v36 = vpop.f32.mrb[30].mxu0 }
 0x2a7   :  { %v618_v9 = vmul.f32 %v1127_v58, %v1523_v22 }
 0x2a9   :  { %1040 = vset.pattern.permute.xlu1 %v1208_v54  ;;  %1057 = vset.pattern.permute.xlu0 %v1209_v56 }
 0x2aa   :  { %661 = vperm.xlu1 %1040, %v1585_v49   ;;  %864 = vperm.xlu0 %1057, %v616_v37  }
 0x2ae   :  { %1042 = vset.pattern.permute.xlu1 %v1209_v56  ;;  %1059 = vset.pattern.permute.xlu0 %v1207_v53 }
 0x2af   :  { %844 = vperm.xlu1 %1042, %v1585_v49   ;;  %772 = vperm.xlu0 %1059, %v617_v45  }
 0x2b3   :  { %1044 = vset.pattern.permute.xlu1 %v1207_v53  ;;  %1060 = vset.pattern.permute.xlu0 %v1208_v54 }
 0x2b4   :  { %752 = vperm.xlu1 %1044, %v1595_v60   ;;  %696 = vperm.xlu0 %1060, %v618_v9  }
 0x2b8   :  { %1046 = vset.pattern.permute.xlu1 %v1208_v54  ;;  %1063 = vset.pattern.permute.xlu0 %v1209_v56 }
 0x2b9   :  { %671 = vperm.xlu1 %1046, %v1610_v6   ;;  %872 = vperm.xlu0 %1063, %v618_v9  }
 0x2bd   :  { %1048 = vset.pattern.permute.xlu1 %v1209_v56 }
 0x2be   :  { %852 = vperm.xlu1 %1048, %v1610_v6   ;;  %v1672_v6 = vpop.f32.mrb[31].mxu0 }
 0x2c2   :  { %1050 = vset.pattern.permute.xlu1 %v1207_v53 }
 0x2c3   :  { %760 = vperm.xlu1 %1050, %v614_v44  }
 0x2c7   :  { %1052 = vset.pattern.permute.xlu1 %v1208_v54 }
 0x2c8   :  { %681 = vperm.xlu1 %1052, %v615_v47  }
 0x2cc   :  { %1054 = vset.pattern.permute.xlu1 %v1209_v56 }
 0x2cd   :  { %860 = vperm.xlu1 %1054, %v615_v47  }
 0x2d1   :  { %1056 = vset.pattern.permute.xlu1 %v1207_v53 }
 0x2d2   :  { %768 = vperm.xlu1 %1056, %v616_v37  }
 0x2d6   :  { %1058 = vset.pattern.permute.xlu1 %v1208_v54 }
 0x2d7   :  { %691 = vperm.xlu1 %1058, %v617_v45  }
 0x2d9   :  { %v622_v19 = vpop.permute.xlu0 %621  ;;  %v717_v22 = vpop.permute.xlu1 %716 }
 0x2da   :  { %v699_v49 = vmul.f32 %v622_v19, %v1528_v50  ;;  %v779_v60 = vmul.f32 %v717_v22, %v1530_v27 }
 0x2db   :  { %1061 = vset.pattern.permute.xlu1 %v1207_v53 }
 0x2dc   :  { %v795_v0 = vadd.f32 %v779_v60, %v699_v49  ;;  %776 = vperm.xlu1 %1061, %v618_v9  }
 0x2de   :  { %v813_v44 = vpop.permute.xlu0 %812  ;;  %v627_v46 = vpop.permute.xlu1 %626 }
 0x2df   :  { %v875_v4 = vmul.f32 %v813_v44, %v1318_v2  ;;  %v700_v50 = vmul.f32 %v627_v46, %v1535_v33 }
 0x2e0   :  { %1062 = vset.pattern.permute.xlu1 %v1209_v56 }
 0x2e1   :  { %v891_v54 = vadd.f32 %v875_v4, %v795_v0  ;;  %868 = vperm.xlu1 %1062, %v617_v45  }
 0x2e3   :  { %907 = vst [vmem:[#allocation7] sm:$0xff] %v891_v54  ;;  %v721_v47 = vpop.permute.xlu0 %720  ;;  %v817_v28 = vpop.permute.xlu1 %816 }
 0x2e4   :  { %v780_v27 = vmul.f32 %v721_v47, %v1539_v59  ;;  %v876_v53 = vmul.f32 %v817_v28, %v1324_v5 }
 0x2e6   :  { %v796_v48 = vadd.f32 %v780_v27, %v700_v50 }
 0x2e8   :  { %v892_v37 = vadd.f32 %v876_v53, %v796_v48  ;;  %v632_v24 = vpop.permute.xlu1 %631  ;;  %v825_v49 = vpop.permute.xlu0 %824 }
 0x2e9   :  { %v701_v2 = vmul.f32 %v632_v24, %v1545_v41  ;;  %v878_v0 = vmul.f32 %v825_v49, %v1336_v11 }
 0x2ea   :  { %908 = vst [vmem:[#allocation7 + $0x8] sm:$0xff] %v892_v37 }
 0x2ed   :  { %v725_v58 = vpop.permute.xlu1 %724  ;;  %v733_v44 = vpop.permute.xlu0 %732 }
 0x2ee   :  { %v781_v56 = vmul.f32 %v725_v58, %v1547_v43  ;;  %v783_v43 = vmul.f32 %v733_v44, %v1558_v15 }
 0x2f0   :  { %v797_v9 = vadd.f32 %v781_v56, %v701_v2 }
 0x2f2   :  { %v821_v45 = vpop.permute.xlu1 %820  ;;  %v833_v28 = vpop.permute.xlu0 %832 }
 0x2f3   :  { %v877_v19 = vmul.f32 %v821_v45, %v1330_v8  ;;  %v880_v37 = vmul.f32 %v833_v28, %v1348_v17 }
 0x2f5   :  { %v893_v22 = vadd.f32 %v877_v19, %v797_v9 }
 0x2f7   :  { %909 = vst [vmem:[#allocation7 + $0x10] sm:$0xff] %v893_v22  ;;  %v637_v33 = vpop.permute.xlu1 %636 }
 0x2f8   :  { %v702_v5 = vmul.f32 %v637_v33, %v1549_v63 }
 0x2fc   :  { %v729_v59 = vpop.permute.xlu1 %728 }
 0x2fd   :  { %v782_v60 = vmul.f32 %v729_v59, %v1551_v39  ;;  %v741_v39 = vpop.permute.xlu0 %740 }
 0x2fe   :  { %v785_v2 = vmul.f32 %v741_v39, %v1572_v25 }
 0x2ff   :  { %v798_v46 = vadd.f32 %v782_v60, %v702_v5 }
 0x301   :  { %v894_v41 = vadd.f32 %v878_v0, %v798_v46  ;;  %v642_v4 = vpop.permute.xlu1 %641  ;;  %v841_v15 = vpop.permute.xlu0 %840 }
 0x302   :  { %v703_v54 = vmul.f32 %v642_v4, %v1554_v1  ;;  %v882_v25 = vmul.f32 %v841_v15, %v1360_v23 }
 0x303   :  { %910 = vst [vmem:[#allocation7 + $0x18] sm:$0xff] %v894_v41 }
 0x304   :  { %v799_v8 = vadd.f32 %v783_v43, %v703_v54 }
 0x305   :  { %v749_v9 = vpop.permute.xlu0 %748 }
 0x306   :  { %v829_v47 = vpop.permute.xlu1 %828  ;;  %v787_v0 = vmul.f32 %v749_v9, %v1591_v51 }
 0x307   :  { %v879_v50 = vmul.f32 %v829_v47, %v1342_v14 }
 0x309   :  { %v895_v27 = vadd.f32 %v879_v50, %v799_v8 }
 0x30b   :  { %911 = vst [vmem:[#allocation7 + $0x20] sm:$0xff] %v895_v27  ;;  %v647_v63 = vpop.permute.xlu1 %646 }
 0x30c   :  { %v704_v11 = vmul.f32 %v647_v63, %v1563_v10  ;;  %v667_v10 = vpop.permute.xlu0 %666 }
 0x310   :  { %v737_v53 = vpop.permute.xlu1 %736  ;;  %v849_v17 = vpop.permute.xlu0 %848 }
 0x311   :  { %v784_v48 = vmul.f32 %v737_v53, %v1565_v16  ;;  %v884_v8 = vmul.f32 %v849_v17, %v1372_v29 }
 0x313   :  { %v800_v24 = vadd.f32 %v784_v48, %v704_v11 }
 0x315   :  { %v896_v1 = vadd.f32 %v880_v37, %v800_v24  ;;  %v652_v58 = vpop.permute.xlu1 %651 }
 0x316   :  { %v705_v56 = vmul.f32 %v652_v58, %v1568_v21 }
 0x317   :  { %912 = vst [vmem:[#allocation7 + $0x28] sm:$0xff] %v896_v1 }
 0x318   :  { %v801_v14 = vadd.f32 %v785_v2, %v705_v56 }
 0x31a   :  { %v837_v45 = vpop.permute.xlu1 %836 }
 0x31b   :  { %v881_v19 = vmul.f32 %v837_v45, %v1354_v20  ;;  %v757_v20 = vpop.permute.xlu0 %756  ;;  %v1745_v45 = vld [vmem:[#allocation11_spill] sm:$0xff] }
 0x31c   :  { %v789_v50 = vmul.f32 %v757_v20, %v1614_v62 }
 0x31d   :  { %v897_v22 = vadd.f32 %v881_v19, %v801_v14 }
 0x31f   :  { %913 = vst [vmem:[#allocation7 + $0x30] sm:$0xff] %v897_v22  ;;  %v657_v16 = vpop.permute.xlu1 %656  ;;  %v677_v43 = vpop.permute.xlu0 %676 }
 0x320   :  { %v706_v49 = vmul.f32 %v657_v16, %v1580_v31 }
 0x323   :  { %v857_v51 = vpop.permute.xlu0 %856 }
 0x324   :  { %v745_v33 = vpop.permute.xlu1 %744  ;;  %v886_v37 = vmul.f32 %v857_v51, %v1384_v35 }
 0x325   :  { %v786_v59 = vmul.f32 %v745_v33, %v1582_v40  ;;  %v708_v40 = vmul.f32 %v667_v10, %v1599_v57 }
 0x327   :  { %v802_v5 = vadd.f32 %v786_v59, %v706_v49  ;;  %v765_v63 = vpop.permute.xlu0 %764 }
 0x329   :  { %v898_v21 = vadd.f32 %v882_v25, %v802_v5  ;;  %v662_v60 = vpop.permute.xlu1 %661  ;;  %v1746_v25 = vld [vmem:[#allocation13_spill] sm:$0xff] }
 0x32a   :  { %v707_v44 = vmul.f32 %v662_v60, %v1587_v52 }
 0x32b   :  { %914 = vst [vmem:[#allocation7 + $0x38] sm:$0xff] %v898_v21  ;;  %v687_v29 = vpop.permute.xlu0 %686 }
 0x32c   :  { %v803_v46 = vadd.f32 %v787_v0, %v707_v44  ;;  %v1747_v0 = vld [vmem:[#allocation12_spill] sm:$0xff] }
 0x32e   :  { %v845_v41 = vpop.permute.xlu1 %844 }
 0x32f   :  { %v883_v4 = vmul.f32 %v845_v41, %v1366_v26  ;;  %v865_v58 = vpop.permute.xlu0 %864 }
 0x330   :  { %v888_v19 = vmul.f32 %v865_v58, %v1745_v45 }
 0x331   :  { %v899_v54 = vadd.f32 %v883_v4, %v803_v46 }
 0x333   :  { %915 = vst [vmem:[#allocation7 + $0x40] sm:$0xff] %v899_v54  ;;  %v753_v31 = vpop.permute.xlu1 %752  ;;  %v773_v14 = vpop.permute.xlu0 %772 }
 0x334   :  { %v788_v23 = vmul.f32 %v753_v31, %v1605_v61  ;;  %v710_v61 = vmul.f32 %v677_v43, %v1620_v12  ;;  %v793_v16 = vmul.f32 %v773_v14, %v1650_v34 }
 0x336   :  { %v804_v47 = vadd.f32 %v788_v23, %v708_v40 }
 0x338   :  { %v900_v28 = vadd.f32 %v884_v8, %v804_v47  ;;  %v672_v52 = vpop.permute.xlu1 %671 }
 0x339   :  { %v709_v27 = vmul.f32 %v672_v52, %v1607_v3  ;;  %v791_v3 = vmul.f32 %v765_v63, %v1631_v18  ;;  %v697_v18 = vpop.permute.xlu0 %696 }
 0x33a   :  { %916 = vst [vmem:[#allocation7 + $0x48] sm:$0xff] %v900_v28  ;;  %v714_v59 = vmul.f32 %v697_v18, %v1656_v36 }
 0x33b   :  { %v805_v26 = vadd.f32 %v789_v50, %v709_v27 }
 0x33d   :  { %v853_v39 = vpop.permute.xlu1 %852  ;;  %v873_v17 = vpop.permute.xlu0 %872 }
 0x33e   :  { %v885_v53 = vmul.f32 %v853_v39, %v1378_v32 }
 0x340   :  { %v901_v11 = vadd.f32 %v885_v53, %v805_v26 }
 0x342   :  { %917 = vst [vmem:[#allocation7 + $0x50] sm:$0xff] %v901_v11  ;;  %v761_v57 = vpop.permute.xlu1 %760 }
 0x343   :  { %v790_v48 = vmul.f32 %v761_v57, %v1624_v42  ;;  %v712_v42 = vmul.f32 %v687_v29, %v1637_v7 }
 0x345   :  { %v806_v15 = vadd.f32 %v790_v48, %v710_v61 }
 0x347   :  { %v902_v62 = vadd.f32 %v886_v37, %v806_v15  ;;  %v682_v24 = vpop.permute.xlu1 %681 }
 0x348   :  { %v711_v1 = vmul.f32 %v682_v24, %v1627_v13 }
 0x349   :  { %918 = vst [vmem:[#allocation7 + $0x58] sm:$0xff] %v902_v62 }
 0x34a   :  { %v807_v32 = vadd.f32 %v791_v3, %v711_v1 }
 0x34c   :  { %v861_v2 = vpop.permute.xlu1 %860 }
 0x34d   :  { %v887_v56 = vmul.f32 %v861_v2, %v1390_v38 }
 0x34f   :  { %v903_v12 = vadd.f32 %v887_v56, %v807_v32 }
 0x351   :  { %919 = vst [vmem:[#allocation7 + $0x60] sm:$0xff] %v903_v12  ;;  %v769_v9 = vpop.permute.xlu1 %768 }
 0x352   :  { %v792_v35 = vmul.f32 %v769_v9, %v1643_v30  ;;  %v890_v30 = vmul.f32 %v873_v17, %v1746_v25 }
 0x354   :  { %v808_v22 = vadd.f32 %v792_v35, %v712_v42 }
 0x356   :  { %v904_v10 = vadd.f32 %v888_v19, %v808_v22  ;;  %v692_v13 = vpop.permute.xlu1 %691 }
 0x357   :  { %v713_v33 = vmul.f32 %v692_v13, %v1646_v55 }
 0x358   :  { %920 = vst [vmem:[#allocation7 + $0x68] sm:$0xff] %v904_v10 }
 0x359   :  { %v809_v38 = vadd.f32 %v793_v16, %v713_v33 }
 0x35b   :  { %v777_v49 = vpop.permute.xlu1 %776 }
 0x35c   :  { %v794_v7 = vmul.f32 %v777_v49, %v1672_v6 }
 0x35e   :  { %v810_v5 = vadd.f32 %v794_v7, %v714_v59 }
 0x360   :  { %v906_v21 = vadd.f32 %v890_v30, %v810_v5  ;;  %v869_v60 = vpop.permute.xlu1 %868 }
 0x361   :  { %v889_v44 = vmul.f32 %v869_v60, %v1747_v0 }
 0x362   :  { %922 = vst [vmem:[#allocation7 + $0x78] sm:$0xff] %v906_v21 }
 0x363   :  { %v905_v34 = vadd.f32 %v889_v44, %v809_v38 }
 0x365   :  { %921 = vst [vmem:[#allocation7 + $0x70] sm:$0xff] %v905_v34 }
 0x366   :  { %1183 = shalt.err (!%p1180_p6)
}
 0x367   :  { %s1184_s12 = scalar_lea.hbm %s1738_s2, 2048 }
 0x368   :  { %p1185_p7 = scmp.ne.s32.totalorder %s1738_s2, %s1184_s12  ;;  %p1188_p8 = scmp.lt.u32.totalorder %s1184_s12, %s1738_s2 }
 0x36a   :  { %p1190_p9 = pnand %p1188_p8, %p1185_p7 }
 0x36c   :  { %1193 = shalt.err (!%p1190_p9)
}
 0x36d   :  { %934 = dma.vmem_to_hbm [thread:$0]  %s929_s8, 2048, %s1738_s2, [#allocation4], %s1201_s19, %s1201_s19, %s1202_s20  }
 0x36e   :  { %1198 = dma.done.wait [#allocation4], 2048  }
 0x36f   :  { %1199 = vsyncadd [#allocation4], 4294965248 }
 0x370   :  { %938 = vsyncpa [#allocation3], 1 }
 0x371   :  { %939 = vsyncpa [#allocation6], 1 }
 0x372   :  { %940 = vsyncpa [#allocation4], 1 }

</bundles_post_ra>
